<compile_context>
chip_gen: v6e
topology: v6e:2x2x1
jax: 0.10.0
libtpu: 0.0.40
codegen_flags: <defaults>
</compile_context>

<pallas_src>
import functools

import jax
import jax.numpy as jnp
from jax.experimental import pallas as pl
from jax.experimental.pallas import tpu as pltpu


# --------------------------- pass 1: fused pooling ---------------------------

def _pool_kernel(x_ref, o_ref, *, hw):
    """Grid = (B, HW//tS). x block: (1, C, tS); out block: (1, 2, C) (row0=avg, row1=max)."""
    s_id = pl.program_id(1)
    x = x_ref[...].astype(jnp.float32)                     # (1, C, tS) - read once
    part_sum = jnp.sum(x, axis=2)[:, None, :]              # (1, 1, C)
    part_max = jnp.max(x, axis=2)[:, None, :]              # (1, 1, C)

    row = jax.lax.broadcasted_iota(jnp.int32, o_ref.shape, 1)   # (1, 2, C)
    is_sum = row == 0
    part = jnp.where(is_sum,
                     jnp.broadcast_to(part_sum, o_ref.shape),
                     jnp.broadcast_to(part_max, o_ref.shape))

    @pl.when(s_id == 0)
    def _init():
        o_ref[...] = jnp.where(is_sum, 0.0, -jnp.inf).astype(o_ref.dtype)

    cur = o_ref[...]
    o_ref[...] = jnp.where(is_sum, cur + part, jnp.maximum(cur, part)).astype(o_ref.dtype)

    @pl.when(s_id == pl.num_programs(1) - 1)
    def _finalize():
        o_ref[...] = jnp.where(is_sum, o_ref[...] * jnp.float32(1.0 / hw),
                               o_ref[...]).astype(o_ref.dtype)


# ---------------------- pass 2: attention + broadcast ------------------------

def _attn_kernel(stats_ref, w1t_ref, b1_ref, w2t_ref, b2_ref,
                 sqwt_ref, sqb_ref, exw_ref, col_ref, exb_ref,
                 o_ref, attn_sc, *, H, W):
    """Grid = (B, C//tC). stats block: (1, 2, C); out block: (1, tC, HW)."""
    f32 = jnp.float32
    HW = H * W

    # Attention map depends only on the batch -> compute once per batch on the
    # first C-tile into VMEM scratch; every C-tile only broadcast-stores it.
    @pl.when(pl.program_id(1) == 0)
    def _compute_attention():
        stats = stats_ref[0].astype(f32)                   # (2, C): row0=avg, row1=max

        # CAM excitation: shared MLP, both branches batched into one matmul.
        h = jnp.maximum(
            jnp.dot(stats, w1t_ref[...], preferred_element_type=f32) + b1_ref[...], 0.0)
        z = jnp.dot(h, w2t_ref[...], preferred_element_type=f32) + b2_ref[...]
        z_cam = jax.nn.sigmoid(jnp.sum(z, axis=0, keepdims=True))            # (1, C)

        # SAM squeeze: 1x1 conv (C -> Cr) on the spatially-constant gate + ReLU.
        v = jnp.maximum(
            jnp.dot(z_cam, sqwt_ref[...], preferred_element_type=f32) + sqb_ref[...], 0.0)

        # SAM excitation: 3x3 conv, zero padding=1, out_channels=1.  Input is
        # spatially constant, so out(p) = sum_t s[t] * in_bounds_t(p) + bias.
        # Per-tap in-bounds masks are built on the fly from iotas + a tiny
        # (1, HW) column-index vector (no (9, HW) HBM table).
        s = jnp.dot(v, exw_ref[...], preferred_element_type=f32)             # (1, 9)

        pos = jax.lax.broadcasted_iota(jnp.int32, (9, HW), 1)   # flat spatial index
        tap = jax.lax.broadcasted_iota(jnp.int32, (9, HW), 0)   # tap index kh*3+kw
        dh = jnp.where(tap >= 6, 1, jnp.where(tap >= 3, 0, -1))
        dw = tap - (dh + 1) * 3 - 1
        row_ok = jnp.where(dh == -1, pos >= W,
                           jnp.where(dh == 1, pos < (H - 1) * W, True))
        cc = col_ref[...] + dw                                   # column index of the tap
        col_ok = (cc >= 0) & (cc < W)
        mask = (row_ok & col_ok).astype(f32)                     # (9, HW)

        acc = jnp.dot(s, mask, preferred_element_type=f32) + exb_ref[0, 0]   # (1, HW)
        attn_sc[...] = jax.nn.sigmoid(acc)

    # Lane-dense broadcast store of the per-batch attention map.
    attn = attn_sc[...]                                          # (1, HW)
    o_ref[...] = jnp.broadcast_to(attn[:, None, :], o_ref.shape).astype(o_ref.dtype)


# ------------------------------- sizing helpers -------------------------------

def _vmem_capacity_bytes():
    try:
        info = pltpu.get_tpu_info()
        cap = int(getattr(info, "vmem_capacity_bytes", 0))
        if cap > 0:
            return cap
    except Exception:
        pass
    return 64 << 20   # conservative fallback: fits every generation


def _vmem_budget(cap):
    # ~40 MiB on 64 MiB parts (v7x), ~96 MiB on 128 MiB parts (v5e/v6e).
    return max(min(cap * 3 // 4, cap - (24 << 20)), 16 << 20)


def _pick_c_tile(C, HW, itemsize, tile_budget):
    """Largest C-tile dividing C, 8-aligned (or full C), whose double-buffered
    output block fits the budget.  Prefers tC == C (grid collapses)."""
    cands = [t for t in range(1, C + 1) if C % t == 0 and (t == C or t % 8 == 0)]
    fitting = [t for t in cands if 2 * t * HW * itemsize <= tile_budget]
    return max(fitting) if fitting else min(cands)


def _pick_s_tile(C, HW, itemsize, tile_budget):
    """Spatial tile for the pooling pass: divides HW and is 128-aligned (or the
    full HW) so partial blocks never feed the reduction."""
    cands = [t for t in range(128, HW + 1, 128) if HW % t == 0]
    cands.append(HW)
    fitting = [t for t in cands if 2 * C * t * itemsize <= tile_budget]
    if fitting:
        return max(fitting)
    # TODO(synk): pathological HW (no 128-aligned divisor and full-HW block
    # over budget) would need in-kernel masking of a partial last tile.
    return min(cands)


# ---------------------------------- wrapper -----------------------------------

def make_params(key, c, ratio):
    cr = c // ratio
    ks = jax.random.split(key, 8)
    sc = 0.2
    return dict(
        w1=jax.random.normal(ks[0], (cr, c), jnp.float32) * sc,    # Linear(c, c/r).weight
        b1=jax.random.normal(ks[1], (cr,), jnp.float32) * sc,
        w2=jax.random.normal(ks[2], (c, cr), jnp.float32) * sc,    # Linear(c/r, c).weight
        b2=jax.random.normal(ks[3], (c,), jnp.float32) * sc,
        sqw=jax.random.normal(ks[4], (cr, c), jnp.float32) * sc,   # Conv2d 1x1 weight (squeezed)
        sqb=jax.random.normal(ks[5], (cr,), jnp.float32) * sc,
        exw=jax.random.normal(ks[6], (1, cr, 3, 3), jnp.float32) * sc,  # Conv2d 3x3 weight (OIHW)
        exb=jax.random.normal(ks[7], (), jnp.float32) * sc,
    )


def cbam_block(x, p):
    B, C, H, W = x.shape
    HW = H * W
    Cr = p['w1'].shape[0]
    dtype = x.dtype
    itemsize = jnp.dtype(dtype).itemsize

    cap = _vmem_capacity_bytes()
    budget = _vmem_budget(cap)

    # Lane-dense layout: last dim = H*W (free metadata reshape in NCHW).
    x2 = x.reshape(B, C, HW)

    # ----- pass 1: fused global avg/max pooling -> stats (B, 2, C) -----
    tS = _pick_s_tile(C, HW, itemsize, budget - (4 << 20))
    pool_cost = pl.CostEstimate(
        flops=int(2 * B * C * HW), transcendentals=0,
        bytes_accessed=int(B * C * HW * itemsize + B * 2 * C * 4))
    stats = pl.pallas_call(
        functools.partial(_pool_kernel, hw=HW),
        out_shape=jax.ShapeDtypeStruct((B, 2, C), jnp.float32),
        grid=(B, HW // tS),
        in_specs=[pl.BlockSpec((1, C, tS), lambda b, s: (b, 0, s))],
        out_specs=pl.BlockSpec((1, 2, C), lambda b, s: (b, 0, 0)),
        compiler_params=pltpu.CompilerParams(
            dimension_semantics=("parallel", "arbitrary"),
            vmem_limit_bytes=int(budget)),
        cost_estimate=pool_cost,
    )(x2)

    # ----- parameter prep (pre-transposed, reshaped once, outside the kernel) -----
    w1t = p['w1'].T.astype(jnp.float32)            # (C, Cr)
    b1 = p['b1'].reshape(1, Cr).astype(jnp.float32)
    w2t = p['w2'].T.astype(jnp.float32)            # (Cr, C)
    b2 = p['b2'].reshape(1, C).astype(jnp.float32)
    sqwt = p['sqw'].T.astype(jnp.float32)          # (C, Cr)
    sqb = p['sqb'].reshape(1, Cr).astype(jnp.float32)
    exw = p['exw'].reshape(Cr, 9).astype(jnp.float32)   # OIHW (1,Cr,3,3) -> (Cr, 9)
    exb = p['exb'].reshape(1, 1).astype(jnp.float32)
    colpos = jnp.tile(jnp.arange(W, dtype=jnp.int32), H).reshape(1, HW)  # p % W

    # ----- pass 2: attention + broadcast store, generation-aware tiling -----
    param_bytes = 4 * (C * Cr * 3 + Cr * 2 + C * 2 + Cr * 9)
    fixed = (2 * param_bytes            # double-buffered params
             + 2 * (2 * C * 4)          # stats block
             + 2 * HW * 4               # colpos
             + HW * 4                   # attn scratch
             + 10 * 9 * HW * 4)         # iota/mask transients (margin)
    tile_budget = max(budget - fixed - (4 << 20), 2 * HW * itemsize)
    tC = _pick_c_tile(C, HW, itemsize, tile_budget)
    n_c = C // tC
    needed = 2 * tC * HW * itemsize + fixed + (4 << 20)
    vmem_limit = int(min(cap - (12 << 20), max(budget, needed)))

    def const_spec(a):
        return pl.BlockSpec(a.shape, lambda b, c: (0, 0))

    in_specs = [
        pl.BlockSpec((1, 2, C), lambda b, c: (b, 0, 0)),          # pooled stats
        const_spec(w1t), const_spec(b1), const_spec(w2t), const_spec(b2),
        const_spec(sqwt), const_spec(sqb), const_spec(exw), const_spec(colpos),
        pl.BlockSpec(memory_space=pltpu.MemorySpace.SMEM),        # exb scalar in SMEM
    ]
    out_specs = pl.BlockSpec((1, tC, HW), lambda b, c: (b, c, 0))

    attn_cost = pl.CostEstimate(
        flops=int(B * (8 * C * Cr + 2 * C * Cr + 2 * Cr * 9 + 2 * 9 * HW)),
        transcendentals=int(B * (C + HW)),
        bytes_accessed=int(B * C * HW * itemsize + B * 2 * C * 4 + param_bytes + HW * 4))

    out = pl.pallas_call(
        functools.partial(_attn_kernel, H=H, W=W),
        out_shape=jax.ShapeDtypeStruct((B, C, HW), dtype),
        grid=(B, n_c),
        in_specs=in_specs,
        out_specs=out_specs,
        scratch_shapes=[pltpu.VMEM((1, HW), jnp.float32)],
        compiler_params=pltpu.CompilerParams(
            dimension_semantics=("parallel", "arbitrary"),
            vmem_limit_bytes=vmem_limit),
        cost_estimate=attn_cost,
    )(stats, w1t, b1, w2t, b2, sqwt, sqb, exw, colpos, exb)
    return out.reshape(B, C, H, W)


# --------------------------------- reference ----------------------------------

def cbam_ref(x, p):
    """Pure-JAX reference matching the PyTorch forward exactly."""
    B, C, H, W = x.shape
    y_avg = x.mean(axis=(2, 3))
    y_max = x.max(axis=(2, 3))

    def mlp(y):
        return jnp.maximum(y @ p['w1'].T + p['b1'], 0.0) @ p['w2'].T + p['b2']

    z_cam = jax.nn.sigmoid(mlp(y_avg) + mlp(y_max))
    z_map = jnp.broadcast_to(z_cam[:, :, None, None], (B, C, H, W))
    y_sam = jnp.einsum('bchw,oc->bohw', z_map, p['sqw']) + p['sqb'][None, :, None, None]
    v = jnp.maximum(y_sam, 0.0)
    z_sam = jax.lax.conv_general_dilated(
        v, p['exw'], window_strides=(1, 1), padding='SAME',
        dimension_numbers=('NCHW', 'OIHW', 'NCHW')) + p['exb']
    return jax.nn.sigmoid(jnp.broadcast_to(z_sam, (B, C, H, W)))


if __name__ == "__main__":
    key = jax.random.PRNGKey(0)
    kx, kp = jax.random.split(key)
    B, C, H, W, ratio = 2, 4, 16, 16, 2
    x = jax.random.normal(kx, (B, C, H, W), jnp.float32)
    params = make_params(kp, C, ratio)

    out = cbam_block(x, params)
    jax.block_until_ready(out)

    ref = cbam_ref(x, params)
    assert out.shape == (B, C, H, W) and out.dtype == jnp.float32
    assert jnp.allclose(out, ref, atol=1e-5, rtol=1e-5), float(jnp.max(jnp.abs(out - ref)))
    print("KERNEL_OK")
</pallas_src>

<mosaic_0001>
module attributes {stable_mosaic.version = 11 : i64} {
  func.func @_pool_kernel(%arg0: i32, %arg1: i32, %arg2: memref<1x4x256xf32, #tpu.memory_space<vmem>>, %arg3: memref<1x2x4xf32, #tpu.memory_space<vmem>>) attributes {dimension_semantics = [#tpu.dimension_semantics<parallel>, #tpu.dimension_semantics<arbitrary>], iteration_bounds = array<i64: 2, 1>, scalar_prefetch = 0 : i64, scratch_operands = 0 : i64, tpu.core_type = #tpu.core_type<tc>, window_params = [{transform_indices = @transform_0, window_bounds = array<i64: 1, 4, 256>}, {transform_indices = @transform_1, window_bounds = array<i64: 1, 2, 4>}]} {
    %c0 = arith.constant 0 : index
    %c0_0 = arith.constant 0 : index
    %c0_1 = arith.constant 0 : index
    %0 = vector.load %arg2[%c0, %c0_0, %c0_1] : memref<1x4x256xf32, #tpu.memory_space<vmem>>, vector<1x4x256xf32>
    %cst = arith.constant dense<0.000000e+00> : vector<1x4xf32>
    %1 = vector.multi_reduction <add>, %0, %cst [2] : vector<1x4x256xf32> to vector<1x4xf32>
    %2 = vector.shape_cast %1 : vector<1x4xf32> to vector<1x1x4xf32>
    %cst_2 = arith.constant dense<0xFF800000> : vector<1x4xf32>
    %3 = vector.multi_reduction <maximumf>, %0, %cst_2 [2] : vector<1x4x256xf32> to vector<1x4xf32>
    %4 = vector.shape_cast %3 : vector<1x4xf32> to vector<1x1x4xf32>
    %5 = tpu.iota {dimensions = array<i32: 1>} : vector<1x2x4xi32>
    %c0_i32 = arith.constant 0 : i32
    %6 = vector.broadcast %c0_i32 : i32 to vector<1x2x4xi32>
    %7 = arith.cmpi eq, %5, %6 : vector<1x2x4xi32>
    %8 = vector.shape_cast %2 : vector<1x1x4xf32> to vector<1x1x4xf32>
    %9 = vector.broadcast %8 : vector<1x1x4xf32> to vector<1x2x4xf32>
    %10 = vector.shape_cast %4 : vector<1x1x4xf32> to vector<1x1x4xf32>
    %11 = vector.broadcast %10 : vector<1x1x4xf32> to vector<1x2x4xf32>
    %12 = arith.select %7, %9, %11 : vector<1x2x4xi1>, vector<1x2x4xf32>
    %c0_i32_3 = arith.constant 0 : i32
    %13 = arith.cmpi eq, %arg1, %c0_i32_3 : i32
    %14 = arith.extui %13 : i1 to i32
    %c0_i32_4 = arith.constant 0 : i32
    %15 = arith.cmpi ne, %14, %c0_i32_4 : i32
    scf.if %15 {
      %cst_13 = arith.constant 0.000000e+00 : f32
      %cst_14 = arith.constant 0xFF800000 : f32
      %24 = vector.broadcast %cst_13 : f32 to vector<1x2x4xf32>
      %25 = vector.broadcast %cst_14 : f32 to vector<1x2x4xf32>
      %26 = arith.select %7, %24, %25 : vector<1x2x4xi1>, vector<1x2x4xf32>
      %c0_15 = arith.constant 0 : index
      %c0_16 = arith.constant 0 : index
      %c0_17 = arith.constant 0 : index
      %27 = vector.load %arg3[%c0_15, %c0_16, %c0_17] : memref<1x2x4xf32, #tpu.memory_space<vmem>>, vector<1x2x4xf32>
      tpu.vector_store %arg3[%c0_15, %c0_16, %c0_17], %26 {strides = array<i32>} : memref<1x2x4xf32, #tpu.memory_space<vmem>>, vector<1x2x4xf32>,
    } else {
    }
    %c0_5 = arith.constant 0 : index
    %c0_6 = arith.constant 0 : index
    %c0_7 = arith.constant 0 : index
    %16 = vector.load %arg3[%c0_5, %c0_6, %c0_7] : memref<1x2x4xf32, #tpu.memory_space<vmem>>, vector<1x2x4xf32>
    %17 = arith.addf %16, %12 : vector<1x2x4xf32>
    %18 = arith.maximumf %16, %12 : vector<1x2x4xf32>
    %19 = arith.select %7, %17, %18 : vector<1x2x4xi1>, vector<1x2x4xf32>
    %c0_8 = arith.constant 0 : index
    %c0_9 = arith.constant 0 : index
    %c0_10 = arith.constant 0 : index
    %20 = vector.load %arg3[%c0_8, %c0_9, %c0_10] : memref<1x2x4xf32, #tpu.memory_space<vmem>>, vector<1x2x4xf32>
    tpu.vector_store %arg3[%c0_8, %c0_9, %c0_10], %19 {strides = array<i32>} : memref<1x2x4xf32, #tpu.memory_space<vmem>>, vector<1x2x4xf32>,
    %c0_i32_11 = arith.constant 0 : i32
    %21 = arith.cmpi eq, %arg1, %c0_i32_11 : i32
    %22 = arith.extui %21 : i1 to i32
    %c0_i32_12 = arith.constant 0 : i32
    %23 = arith.cmpi ne, %22, %c0_i32_12 : i32
    scf.if %23 {
      %c0_13 = arith.constant 0 : index
      %c0_14 = arith.constant 0 : index
      %c0_15 = arith.constant 0 : index
      %24 = vector.load %arg3[%c0_13, %c0_14, %c0_15] : memref<1x2x4xf32, #tpu.memory_space<vmem>>, vector<1x2x4xf32>
      %cst_16 = arith.constant 3.906250e-03 : f32
      %25 = vector.broadcast %cst_16 : f32 to vector<1x2x4xf32>
      %26 = arith.mulf %24, %25 : vector<1x2x4xf32>
      %c0_17 = arith.constant 0 : index
      %c0_18 = arith.constant 0 : index
      %c0_19 = arith.constant 0 : index
      %27 = vector.load %arg3[%c0_17, %c0_18, %c0_19] : memref<1x2x4xf32, #tpu.memory_space<vmem>>, vector<1x2x4xf32>
      %28 = arith.select %7, %26, %27 : vector<1x2x4xi1>, vector<1x2x4xf32>
      %c0_20 = arith.constant 0 : index
      %c0_21 = arith.constant 0 : index
      %c0_22 = arith.constant 0 : index
      %29 = vector.load %arg3[%c0_20, %c0_21, %c0_22] : memref<1x2x4xf32, #tpu.memory_space<vmem>>, vector<1x2x4xf32>
      tpu.vector_store %arg3[%c0_20, %c0_21, %c0_22], %28 {strides = array<i32>} : memref<1x2x4xf32, #tpu.memory_space<vmem>>, vector<1x2x4xf32>,
    } else {
    }
    return
  }
  func.func @transform_0(%arg0: i32, %arg1: i32) -> (i32, i32, i32) {
    %c0_i32 = arith.constant 0 : i32
    %c0_i32_0 = arith.constant 0 : i32
    return %arg0, %c0_i32, %arg1 : i32, i32, i32
  }
  func.func @transform_1(%arg0: i32, %arg1: i32) -> (i32, i32, i32) {
    %c0_i32 = arith.constant 0 : i32
    %c0_i32_0 = arith.constant 0 : i32
    %c0_i32_1 = arith.constant 0 : i32
    return %arg0, %c0_i32, %c0_i32_0 : i32, i32, i32
  }
}

</mosaic_0001>

<bundles_post_ra>
// kernel: tpu_custom_call.1
= control target key start
LH: loop header
LB: loop body
LE: loop exit
PB: predicated region body
PF: predicated region fallthrough
CT: control target
= control target key end

     0   :  { %6 = vsyncpa [#allocation3], 0  ;;  %s648_s0 = inlined_call_operand.hbm [shape: f32[2,4,256], index: 0, kind: input, shape index: {}]   ;;  %s649_s1 = inlined_call_operand.hbm [shape: f32[2,2,4], index: 1, kind: output, shape index: {}]  }
   0x1   :  { %8 = vsyncpa [#allocation3 + $0x1], 0 }
   0x2   :  { %9 = vsyncpa [#allocation4], 0 }
   0x3   :  { %11 = vsyncpa [#allocation4 + $0x1], 0  ;;  %s500_s6 = smov 0   ;;  %s502_s7 = smov 0  }
   0x4   :  { %s504_s8 = smov 0   ;;  %s506_s9 = smov 0  }
   0x5   :  { %s508_s10 = smov 0   ;;  %s510_s11 = smov 0  }
   0x6 LB: > { %s298_s12 = sadd.s32 4294967295, %s485_s11   ;;  %s299_s13 = sadd.s32 4294967294, %s485_s11   ;;  %s485_s11 = sphi %s510_s11, %s17_s11   ;;  %s481_s10 = sphi %s508_s10, %s661_s10   ;;  %s477_s9 = sphi %s506_s9, %s660_s9   ;;  %s473_s8 = sphi %s504_s8, %s659_s8   ;;  %s469_s7 = sphi %s502_s7, %s658_s7   ;;  %s465_s6 = sphi %s500_s6, %s657_s6  }
   0x7   : > { %s29_s14 = sadd.s32 1, %s481_s10  ;;  %s38_s15 = sadd.s32 1, %s473_s8 }
   0x8   : > { %p31_p0 = scmp.ge.s32.totalorder %s29_s14, 2  ;;  %p45_p1 = scmp.ne.s32.totalorder %s473_s8, %s469_s7 }
   0x9   : > { %p46_p2 = scmp.eq.s32.totalorder %s485_s11, 0  ;;  %p51_p3 = scmp.ne.s32.totalorder %s469_s7, %s465_s6 }
   0xa   : > { %s663_s14 = smov (%p31_p0, %s29_s14), 0  ;;  %p52_p5 = scmp.eq.s32.totalorder %s298_s12, 0 }
   0xb   : > { %p541_p4 = por %p46_p2, %p45_p1  ;;  %s33_s17 = ssub.s32 %s481_s10, %s663_s14 }
   0xc   : > { %p75_p6 = scmp.eq.s32.totalorder %s298_s12, 1  ;;  %p36_p7 = scmp.eq.s32.totalorder %s33_s17, 0 }
   0xd   : > { %p547_p8 = por %p52_p5, %p51_p3  ;;  %p81_p10 = scmp.eq.s32.totalorder %s299_s13, 1 }
   0xe   : > { %p551_p9 = por %p75_p6, %p45_p1  ;;  %p325_p13 = scmp.lt.s32.totalorder %s485_s11, 2 }
   0xf   : > { %s556_s20 = scalar_select %p36_p7, %s473_s8, %s38_s15  }
  0x10   : > { %p558_p11 = por %p81_p10, %p51_p3  ;;  %s101_s22 = sand.u32 1, %s473_s8  }
  0x11   : > { %s302_s23 = sshll.u32 %s101_s22, 3  ;;  %s312_s24 = sshll.u32 %s481_s10, 7 }
  0x12   : > { %s653_s21 = scalar_select %p558_p11, 1, 0 }
  0x13   : > { %s113_s27 = scalar_lea.hbm %s648_s0, %s312_s24  ;;  %s105_s28 = scalar_lea.vmem [#allocation2], %s302_s23 }
  0x14   : > { %s115_s29 = sshll.u32 %s105_s28, 4  ;;  %p571_p0 = pnand %p325_p13, %p541_p4  ;;  %s116_s29 = int_to_ptr.vmem [resolvable:$true] %s115_s29 }
  0x15   : > { %p305_p1 = scmp.ge.s32.totalorder %s485_s11, 1  ;;  %p120_p2 = scmp.lt.s32.totalorder %s485_s11, 3 }
  0x16   : > { %s102_s2 = scalar_lea.sflag [#allocation3], %s101_s22  ;;  %p379_p3 = pneg %p571_p0 }
  0x17   : > { %s390_s3 = scalar_lea.vmem %s116_s29, 128  ;;  %s487_s4 = smov [#allocation2]  }
  0x18   : > { %p391_p5 = scmp.ne.s32.totalorder %s116_s29, %s390_s3  ;;  %s395_s5 = sshll.u32 %s487_s4, 4  ;;  %s396_s5 = int_to_ptr.vmem [resolvable:$false] %s395_s5 }
  0x19   : > { %s397_s12 = scalar_lea.vmem %s396_s5, 256  ;;  %p398_p10 = scmp.lt.s32.totalorder %s116_s29, %s396_s5 }
  0x1a   : > { %p393_p6 = pnand %p391_p5, %p379_p3  ;;  %p399_p12 = scmp.lt.s32.totalorder %s397_s12, %s390_s3 }
  0x1c   : > { %p394_p7 = pneg %p393_p6  ;;  %p400_p4 = por %p399_p12, %p398_p10 }
  0x1e   : > { %p401_p13 = pnand %p400_p4, %p394_p7 }
  0x20   : > { %404 = shalt.err (!%p401_p13)
}
  0x21   : > { %320 = dma.hbm_to_vmem [thread:$0]  (!%p571_p0), %s113_s27, 128, %s116_s29, %s102_s2  }
  0x22   : > { %p121_p11 = pnand %p305_p1, %p120_p2 }
  0x23   : > { %s586_s13 = sand.u32 (!%p121_p11), 1, %s469_s7  }
  0x24   : > { %124 = sbr.rel (%p121_p11) target bundleno = 220 (0xdc), region = 24  ;;  %s306_s15 = sshll.u32 (!%p121_p11), %s586_s13, 3 }
  0x25   : > { %s127_s16 = scalar_lea.sflag (!%p121_p11), [#allocation3], %s586_s13  ;;  %s130_s17 = scalar_lea.vmem (!%p121_p11), [#allocation2], %s306_s15 }
  0x29   : > { %456 = dma.done.wait (%p547_p8), %s127_s16, 128  }
  0x2a   : > { %458 = vsyncadd (%p547_p8), %s127_s16, 4294967168  ;;  %s307_s22 = sshll.u32 %s586_s13, 1  ;;  %v165_v0 = vlaneseq  ;;  %vm188_vm0 = vcmask 25600   ;;  %vm154_vm2 = vcmask 1043456   ;;  %v488_v4 = vmov -inf   ;;  %v150_v6 = vld [vmem:[%s130_s17] sm:$0xff] }
  0x2b   : > { %s148_s23 = scalar_lea.vmem [#allocation5], %s307_s22  ;;  %v152_v7 = vcombine.high %v150_v6, %v150_v6  ;;  %v155_v8 = vsel %vm154_vm2, %v150_v6, 0.0  ;;  %v160_v10 = vsel %vm154_vm2, %v150_v6, -inf  ;;  %s309_s18 = sshll.u32 %s477_s9, 5 }
  0x2c   : > { %v166_v1 = vshrl.u32 %v165_v0, 7  ;;  %v170_v2 = vand.u32 127, %v165_v0  ;;  %s217_s24 = sshll.u32 %s148_s23, 4  ;;  %s604_s27 = scalar_lea.hbm %s649_s1, %s309_s18  ;;  %s218_s24 = int_to_ptr.vmem [resolvable:$true] %s217_s24 }
  0x2d   : > { %v156_v9 = vsel %vm154_vm2, %v152_v7, 0.0  ;;  %v161_v11 = vsel %vm154_vm2, %v152_v7, -inf  ;;  %s204_s28 = scalar_lea.sflag [#allocation4], %s586_s13  ;;  %s405_s29 = scalar_lea.vmem %s218_s24, 32 }
  0x2e   : > { %vm167_vm1 = vcmp.eq.s32.totalorder %v166_v1, 0  ;;  %v173_v3 = vsub.s32 %v170_v2, %v166_v1  ;;  %v157_v12 = vadd.f32 %v156_v9, %v155_v8  ;;  %v162_v13 = vmax.f32 %v160_v10, %v161_v11  ;;  %p406_p8 = scmp.ne.s32.totalorder %s218_s24, %s405_s29  ;;  %s489_s9 = smov [#allocation5]  }
  0x2f   : > { %v187_v5 = vsel %vm167_vm1, 0.0, %v488_v4  ;;  %s409_s30 = sshll.u32 %s489_s9, 4  ;;  %s410_s30 = int_to_ptr.vmem [resolvable:$false] %s409_s30 }
  0x30   : > { %189 = vst.msk [vmem:[%s148_s23] sm:$0x3] %vm188_vm0, %v187_v5  ;;  %158 = vadd.xlane.f32.xlu0 %v157_v12  ;;  %p407_p11 = pnand %p406_p8, %p551_p9  ;;  %s411_s2 = scalar_lea.vmem %s410_s30, 64 }
  0x31   : > { %p412_p0 = scmp.lt.s32.totalorder %s218_s24, %s410_s30  ;;  %p413_p1 = scmp.lt.s32.totalorder %s411_s2, %s405_s29 }
  0x32   : > { %p408_p12 = pneg %p407_p11 }
  0x33   : > { %p414_p2 = por %p413_p1, %p412_p0 }
  0x34   : > { %163 = vmax.xlane.f32.xlu0 %v162_v13 }
  0x35   : > { %p415_p3 = pnand %p414_p2, %p408_p12 }
  0x37   : > { %v190_v17 = vld [vmem:[%s148_s23] sm:$0x3] }
  0xb9   : > { %v159_v14 = vpop.xlane.xlu0 %158 }
  0xba   : > { %v174_v16 = vrot.slane %v159_v14, %v173_v3 }
  0xbd   : > { %v164_v15 = vpop.xlane.xlu0 %163 }
  0xbe   : > { %v180_v18 = vrot.slane %v164_v15, %v173_v3 }
  0xc0   : > { %v182_v19 = vsel %vm167_vm1, %v174_v16, %v180_v18 }
  0xc1   : > { %v191_v20 = vadd.f32 %v190_v17, %v182_v19  ;;  %v192_v21 = vmax.f32 %v190_v17, %v182_v19 }
  0xc3   : > { %v193_v22 = vsel %vm167_vm1, %v191_v20, %v192_v21 }
  0xc4   : > { %195 = vst.msk [vmem:[%s148_s23] sm:$0x3] %vm188_vm0, %v193_v22 }
  0xcb   : > { %v199_v23 = vld [vmem:[%s148_s23] sm:$0x3] }
  0xcc   : > { %v200_v24 = vmul.f32 0.00390625, %v199_v23 }
  0xce   : > { %v201_v25 = vsel %vm167_vm1, %v200_v24, %v199_v23 }
  0xcf   : > { %202 = vst.msk [vmem:[%s148_s23] sm:$0x3] %vm188_vm0, %v201_v25 }
  0xd0   : > { %418 = shalt.err (!%p415_p3)
}
  0xd1   : > { %s419_s3 = scalar_lea.hbm %s604_s27, 32  ;;  %s423_s12 = scalar_lea.hbm %s649_s1, 64 }
  0xd2   : > { %p420_p5 = scmp.ne.s32.totalorder %s604_s27, %s419_s3  ;;  %p424_p10 = scmp.lt.s32.totalorder %s604_s27, %s649_s1 }
  0xd3   : > { %p425_p4 = scmp.lt.s32.totalorder %s423_s12, %s419_s3 }
  0xd4   : > { %p421_p6 = pnand %p420_p5, %p551_p9 }
  0xd5   : > { %p426_p13 = por %p425_p4, %p424_p10 }
  0xd6   : > { %p422_p7 = pneg %p421_p6 }
  0xd8   : > { %p427_p8 = pnand %p426_p13, %p422_p7 }
  0xda   : > { %430 = shalt.err (!%p427_p8)
}
  0xdb   : > { %315 = dma.vmem_to_hbm [thread:$0]  (%p551_p9), %s218_s24, 32, %s604_s27, %s204_s28  }
  0xdc PF: > { %s229_s16 = sand.u32 1, %s465_s6   ;;  %p655_p11 = scmp.ne.s32.totalorder %s653_s21, 0 }
  0xdd   : > { %p656_p12 = scmp.ge.s32.totalorder %s485_s11, 2  ;;  %s230_s17 = scalar_lea.sflag [#allocation4], %s229_s16 }
  0xdf   : > { %p322_p0 = pnand %p656_p12, %p655_p11 }
  0xe1   : > { %p323_p1 = pneg %p322_p0 }
  0xe3   : > { %460 = dma.done.wait (%p323_p1), %s230_s17, 32  }
  0xe4   : > { %462 = vsyncadd (%p323_p1), %s230_s17, 4294967264  ;;  %s17_s11 = sadd.s32 1, %s485_s11   ;;  %s657_s6 = smov %s469_s7 }
  0xe5   : > { %p14_p2 = scmp.ge.s32.totalorder %s17_s11, 4   ;;  %s658_s7 = smov %s473_s8 }
  0xe6   : > { %s659_s8 = smov %s556_s20  ;;  %s660_s9 = smov %s481_s10 }
  0xe7   : > { %s661_s10 = smov %s663_s14  ;;  %16 = sbr.rel (!%p14_p2) target bundleno = 6 (0x6), region = 77 }
  0xec   :  { %235 = vsyncpa [#allocation3], 1 }
  0xed   :  { %237 = vsyncpa [#allocation3 + $0x1], 1 }
  0xee   :  { %238 = vsyncpa [#allocation4], 1 }
  0xef   :  { %240 = vsyncpa [#allocation4 + $0x1], 1 }

</bundles_post_ra>
